<compile_context>
chip_gen: v5e
topology: v5e:2x2
jax: 0.10.0
libtpu: 0.0.40
codegen_flags: <defaults>
</compile_context>

<pallas_src>
import functools

import jax
import jax.numpy as jnp
import numpy as np
from jax import lax
from jax.experimental import pallas as pl
from jax.experimental.pallas import tpu as pltpu


def _sepconv_kernel(xf_ref, dwwf_ref, gammal_ref, betal_ref, s_ref, st_ref,
                    bd_ref, pwbl_ref, o_ref, *, K, H_out, Cin, dilation, eps):
    """Fused depthwise conv + BatchNorm (batch stats) + pointwise conv, lane-flattened layout.

    xf_ref    : (N, Hp, Wp*Cin)          spatially pre-padded input, W and Cin flattened on lanes
    dwwf_ref  : (K*K, W_out*Cin)         depthwise tap weights, pre-tiled to lane width (f32)
    gammal_ref: (1, W_out*Cin)           BN weight, tiled to lanes (f32)
    betal_ref : (1, W_out*Cin)           BN bias, tiled to lanes (f32)
    s_ref     : (W_out*Cin, Cin)         group-sum matrix   S[l, c]  = [l % Cin == c]
    st_ref    : (Cin, W_out*Cin)         re-broadcast matrix S^T[c,l] = [l % Cin == c]
    bd_ref    : (W_out*Cin, W_out*Cout)  block-diagonal pointwise weight (bf16)
    pwbl_ref  : (1, W_out*Cout)          pointwise bias, tiled to lanes (f32)
    o_ref     : (N*H_out, W_out*Cout)    lane-dense output slab
    """
    N = xf_ref.shape[0]
    Lin = gammal_ref.shape[1]
    W_out = Lin // Cin
    inv_count = 1.0 / float(N * H_out * W_out)

    dwwf = dwwf_ref[...]                                       # (K*K, Lin), f32

    # --- depthwise conv (stride-1 over the padded valid region): K*K wide VPU FMAs. ---
    # One kh row-band of the ref is loaded at a time (bounded vreg pressure); the kw shift is a
    # contiguous lane slice.  TODO(synk): if the bundle dump shows these lane slices lowering to
    # relayout copies rather than lane selects, switch to pltpu.roll (XLU slot is idle here).
    acc = None
    for kh in range(K):
        rows = xf_ref[:, kh * dilation: kh * dilation + H_out, :].astype(jnp.float32)
        for kw in range(K):
            start = kw * dilation * Cin
            tap = rows[:, :, start: start + Lin]               # (N, H_out, Lin)
            term = tap * dwwf[kh * K + kw]
            acc = term if acc is None else acc + term
    # The depthwise bias is intentionally omitted: it is cancelled exactly by the training-mode
    # BatchNorm mean subtraction below.

    # --- BatchNorm2d, training-mode (biased) batch stats, SINGLE pass, lane layout. ---
    s1 = jnp.sum(acc, axis=(0, 1)).reshape(1, Lin)             # per-lane sum
    s2 = jnp.sum(acc * acc, axis=(0, 1)).reshape(1, Lin)       # per-lane sum of squares
    stats = jnp.concatenate([s1, s2], axis=0)                  # (2, Lin)
    grouped = jnp.dot(
        jnp.dot(stats, s_ref[...], preferred_element_type=jnp.float32),
        st_ref[...], preferred_element_type=jnp.float32) * inv_count
    mean_l = grouped[0:1, :]                                   # E[x]   per channel, on lanes
    var_l = grouped[1:2, :] - mean_l * mean_l                  # E[x^2] - E[x]^2
    scale_l = gammal_ref[...] * lax.rsqrt(var_l + eps)
    shift_l = betal_ref[...] - mean_l * scale_l
    y = acc * scale_l + shift_l                                # one fused FMA pass

    # --- pointwise 1x1 conv: block-diagonal matmul, bf16 operands / f32 accumulate on the MXU,
    #     written directly as a lane-dense (N*H_out, W_out*Cout) slab (no masked narrow stores).
    y2d = y.reshape(N * H_out, Lin).astype(bd_ref.dtype)
    out = jnp.dot(y2d, bd_ref[...], preferred_element_type=jnp.float32) + pwbl_ref[...]
    o_ref[...] = out.astype(o_ref.dtype)


def make_sep_conv2d(dw_w, dw_b, gamma, beta, pw_w, pw_b, *, H, W,
                    kernel_size=3, stride=1, padding=1, dilation=1, eps=1e-5,
                    pointwise_dtype=jnp.bfloat16):
    """Builds a fused SepConv2d forward for a fixed spatial size (H, W).

    All layout constants are computed ONCE here (hoisted out of the per-call path).
    dw_b is accepted for interface parity with the PyTorch module but unused: a bias added
    before training-mode BatchNorm is cancelled by the mean subtraction.
    dw_w: (Cin,1,K,K)  pw_w: (Cout,Cin,1,1)  gamma/beta/pw_b: (Cin,)/(Cin,)/(Cout,)
    """
    del dw_b
    if stride != 1:
        # TODO(synk): stride>1 needs a subsampled lane layout / strided H index_map; the fused
        # kernel currently targets the module's default stride=1.
        raise NotImplementedError("fused SepConv2d kernel supports stride=1 only")

    Cin = dw_w.shape[0]
    Cout = pw_w.shape[0]
    K = kernel_size
    Hp, Wp = H + 2 * padding, W + 2 * padding
    H_out = Hp - dilation * (K - 1)
    W_out = Wp - dilation * (K - 1)
    Lin, Lout = W_out * Cin, W_out * Cout
    f32 = jnp.float32

    # Depthwise tap weights pre-tiled to lane width (no per-tap broadcasts in-kernel).
    dww = jnp.transpose(dw_w[:, 0], (1, 2, 0)).astype(f32)                     # (K, K, Cin)
    dwwf = jnp.tile(dww.reshape(K * K, 1, Cin), (1, W_out, 1)).reshape(K * K, Lin)
    gamma_l = jnp.tile(gamma.astype(f32), W_out).reshape(1, Lin)
    beta_l = jnp.tile(beta.astype(f32), W_out).reshape(1, Lin)
    pwb_l = jnp.tile(pw_b.astype(f32), W_out).reshape(1, Lout)

    # Rectangular group-sum / re-broadcast matrices: 2*Lin*Cin elements total, replacing the
    # old dense Lin^2 "gn" constant (which would be 64 MiB at Lin=4096 on v7x).
    r = jnp.arange(Lin) % Cin
    S = (r[:, None] == jnp.arange(Cin)[None, :]).astype(f32)                   # (Lin, Cin)
    ST = jnp.transpose(S)                                                      # (Cin, Lin)

    # Block-diagonal pointwise weight in bf16 for the MXU:
    #   bd[w*Cin + c, v*Cout + f] = (w == v) * pw[c, f].
    pww = jnp.transpose(pw_w[:, :, 0, 0], (1, 0)).astype(f32)                  # (Cin, Cout)
    bd = (jnp.eye(W_out, dtype=f32)[:, None, :, None] *
          pww[None, :, None, :]).reshape(Lin, Lout).astype(pointwise_dtype)

    kernel = functools.partial(_sepconv_kernel, K=K, H_out=H_out, Cin=Cin,
                               dilation=dilation, eps=eps)

    @jax.jit
    def apply(x_nchw):
        N = x_nchw.shape[0]
        assert x_nchw.shape == (N, Cin, H, W)
        # Layout glue (stays in XLA): NCHW -> NHWC -> zero-pad -> (N, Hp, Wp*Cin) lane-flat.
        x = jnp.transpose(x_nchw, (0, 2, 3, 1))
        xp = jnp.pad(x, ((0, 0), (padding, padding), (padding, padding), (0, 0)))
        xf = xp.reshape(N, Hp, Wp * Cin)

        # Advisory cost of what the kernel actually executes.
        flops = (2 * K * K * N * H_out * Lin                  # depthwise FMAs
                 + 6 * N * H_out * Lin                        # square + BN FMA passes
                 + 2 * 2 * Lin * Cin + 2 * 2 * Cin * Lin      # BN-stats matmuls
                 + 2 * (N * H_out) * Lin * Lout)              # executed block-diag matmul
        bytes_accessed = (4 * xf.size + 4 * dwwf.size + 4 * (S.size + ST.size)
                          + bd.dtype.itemsize * bd.size
                          + 4 * (2 * Lin + Lout) + 4 * N * H_out * Lout)

        out2d = pl.pallas_call(
            kernel,
            out_shape=jax.ShapeDtypeStruct((N * H_out, Lout), x_nchw.dtype),
            in_specs=[pl.BlockSpec(memory_space=pltpu.MemorySpace.VMEM)] * 8,
            out_specs=pl.BlockSpec(memory_space=pltpu.MemorySpace.VMEM),
            # 32 MiB scoped VMEM is safe on every generation (v7x physical = 64 MiB).  At
            # production shapes: add a (N, H-tile) grid with "parallel" dimension_semantics
            # (v7x has 2 TCs) and re-derive tile sizes / this limit per generation.
            compiler_params=pltpu.CompilerParams(vmem_limit_bytes=32 * 1024 * 1024),
            cost_estimate=pl.CostEstimate(flops=flops, transcendentals=Lin,
                                          bytes_accessed=bytes_accessed),
        )(xf, dwwf, gamma_l, beta_l, S, ST, bd, pwb_l)

        out = out2d.reshape(N, H_out, W_out, Cout)
        return jnp.transpose(out, (0, 3, 1, 2))

    return apply


def _reference(x, dw_w, dw_b, gamma, beta, pw_w, pw_b,
               *, stride=1, padding=1, dilation=1, eps=1e-5):
    """Pure-JAX (XLA conv) reference matching PyTorch SepConv2d.forward in training mode."""
    Cin = x.shape[1]
    y = lax.conv_general_dilated(
        x, dw_w, window_strides=(stride, stride),
        padding=[(padding, padding), (padding, padding)],
        rhs_dilation=(dilation, dilation),
        dimension_numbers=("NCHW", "OIHW", "NCHW"),
        feature_group_count=Cin)
    y = y + dw_b[None, :, None, None]
    mean = jnp.mean(y, axis=(0, 2, 3), keepdims=True)
    var = jnp.mean(jnp.square(y - mean), axis=(0, 2, 3), keepdims=True)
    y = (y - mean) / jnp.sqrt(var + eps) * gamma[None, :, None, None] + beta[None, :, None, None]
    y = lax.conv_general_dilated(
        y, pw_w, window_strides=(1, 1), padding="VALID",
        dimension_numbers=("NCHW", "OIHW", "NCHW"))
    return y + pw_b[None, :, None, None]


if __name__ == "__main__":
    N, Cin, H, W = 2, 4, 16, 16
    Cout, K = 8, 3

    key = jax.random.PRNGKey(0)
    ks = jax.random.split(key, 7)
    x = jax.random.normal(ks[0], (N, Cin, H, W), jnp.float32)
    # Parameter shapes follow the PyTorch module's __init__ (deterministic synthetic init).
    dw_w = 0.2 * jax.random.normal(ks[1], (Cin, 1, K, K), jnp.float32)     # depthwise.weight
    dw_b = 0.1 * jax.random.normal(ks[2], (Cin,), jnp.float32)             # depthwise.bias
    gamma = 1.0 + 0.1 * jax.random.normal(ks[3], (Cin,), jnp.float32)      # bn.weight
    beta = 0.1 * jax.random.normal(ks[4], (Cin,), jnp.float32)             # bn.bias
    pw_w = 0.2 * jax.random.normal(ks[5], (Cout, Cin, 1, 1), jnp.float32)  # pointwise.weight
    pw_b = 0.1 * jax.random.normal(ks[6], (Cout,), jnp.float32)            # pointwise.bias

    sep_conv = make_sep_conv2d(dw_w, dw_b, gamma, beta, pw_w, pw_b, H=H, W=W,
                               kernel_size=K, stride=1, padding=1, dilation=1)
    out = jax.block_until_ready(sep_conv(x))

    ref = _reference(x, dw_w, dw_b, gamma, beta, pw_w, pw_b,
                     stride=1, padding=1, dilation=1)
    assert out.shape == ref.shape == (N, Cout, H, W)
    # Tolerance sized for the bf16 pointwise-matmul operands (f32 accumulation on the MXU).
    np.testing.assert_allclose(np.asarray(out), np.asarray(ref), atol=2e-2, rtol=2e-2)
    print("KERNEL_OK")
</pallas_src>

<mosaic_0001>
module attributes {stable_mosaic.version = 11 : i64} {
  func.func @_sepconv_kernel(%arg0: memref<2x18x72xf32, #tpu.memory_space<vmem>>, %arg1: memref<9x64xf32, #tpu.memory_space<vmem>>, %arg2: memref<1x64xf32, #tpu.memory_space<vmem>>, %arg3: memref<1x64xf32, #tpu.memory_space<vmem>>, %arg4: memref<64x4xf32, #tpu.memory_space<vmem>>, %arg5: memref<4x64xf32, #tpu.memory_space<vmem>>, %arg6: memref<64x128xbf16, #tpu.memory_space<vmem>>, %arg7: memref<1x128xf32, #tpu.memory_space<vmem>>, %arg8: memref<32x128xf32, #tpu.memory_space<vmem>>) attributes {dimension_semantics = [], scalar_prefetch = 0 : i64, scratch_operands = 0 : i64, tpu.core_type = #tpu.core_type<tc>} {
    %c0 = arith.constant 0 : index
    %c0_0 = arith.constant 0 : index
    %0 = vector.load %arg1[%c0, %c0_0] : memref<9x64xf32, #tpu.memory_space<vmem>>, vector<9x64xf32>
    %c0_1 = arith.constant 0 : index
    %c0_2 = arith.constant 0 : index
    %c0_3 = arith.constant 0 : index
    %1 = vector.load %arg0[%c0_1, %c0_2, %c0_3] : memref<2x18x72xf32, #tpu.memory_space<vmem>>, vector<2x16x72xf32>
    %2 = vector.extract_strided_slice %1 {offsets = [0, 0, 0], sizes = [2, 16, 64], strides = [1, 1, 1]} : vector<2x16x72xf32> to vector<2x16x64xf32>
    %3 = vector.extract_strided_slice %0 {offsets = [0, 0], sizes = [1, 64], strides = [1, 1]} : vector<9x64xf32> to vector<1x64xf32>
    %4 = vector.shape_cast %3 : vector<1x64xf32> to vector<64xf32>
    %5 = vector.shape_cast %4 : vector<64xf32> to vector<1x1x64xf32>
    %6 = vector.broadcast %5 : vector<1x1x64xf32> to vector<2x16x64xf32>
    %7 = arith.mulf %2, %6 : vector<2x16x64xf32>
    %8 = vector.extract_strided_slice %1 {offsets = [0, 0, 4], sizes = [2, 16, 64], strides = [1, 1, 1]} : vector<2x16x72xf32> to vector<2x16x64xf32>
    %9 = vector.extract_strided_slice %0 {offsets = [1, 0], sizes = [1, 64], strides = [1, 1]} : vector<9x64xf32> to vector<1x64xf32>
    %10 = vector.shape_cast %9 : vector<1x64xf32> to vector<64xf32>
    %11 = vector.shape_cast %10 : vector<64xf32> to vector<1x1x64xf32>
    %12 = vector.broadcast %11 : vector<1x1x64xf32> to vector<2x16x64xf32>
    %13 = arith.mulf %8, %12 : vector<2x16x64xf32>
    %14 = arith.addf %7, %13 : vector<2x16x64xf32>
    %15 = vector.extract_strided_slice %1 {offsets = [0, 0, 8], sizes = [2, 16, 64], strides = [1, 1, 1]} : vector<2x16x72xf32> to vector<2x16x64xf32>
    %16 = vector.extract_strided_slice %0 {offsets = [2, 0], sizes = [1, 64], strides = [1, 1]} : vector<9x64xf32> to vector<1x64xf32>
    %17 = vector.shape_cast %16 : vector<1x64xf32> to vector<64xf32>
    %18 = vector.shape_cast %17 : vector<64xf32> to vector<1x1x64xf32>
    %19 = vector.broadcast %18 : vector<1x1x64xf32> to vector<2x16x64xf32>
    %20 = arith.mulf %15, %19 : vector<2x16x64xf32>
    %21 = arith.addf %14, %20 : vector<2x16x64xf32>
    %c0_4 = arith.constant 0 : index
    %c1 = arith.constant 1 : index
    %c0_5 = arith.constant 0 : index
    %22 = vector.load %arg0[%c0_4, %c1, %c0_5] : memref<2x18x72xf32, #tpu.memory_space<vmem>>, vector<2x16x72xf32>
    %23 = vector.extract_strided_slice %22 {offsets = [0, 0, 0], sizes = [2, 16, 64], strides = [1, 1, 1]} : vector<2x16x72xf32> to vector<2x16x64xf32>
    %24 = vector.extract_strided_slice %0 {offsets = [3, 0], sizes = [1, 64], strides = [1, 1]} : vector<9x64xf32> to vector<1x64xf32>
    %25 = vector.shape_cast %24 : vector<1x64xf32> to vector<64xf32>
    %26 = vector.shape_cast %25 : vector<64xf32> to vector<1x1x64xf32>
    %27 = vector.broadcast %26 : vector<1x1x64xf32> to vector<2x16x64xf32>
    %28 = arith.mulf %23, %27 : vector<2x16x64xf32>
    %29 = arith.addf %21, %28 : vector<2x16x64xf32>
    %30 = vector.extract_strided_slice %22 {offsets = [0, 0, 4], sizes = [2, 16, 64], strides = [1, 1, 1]} : vector<2x16x72xf32> to vector<2x16x64xf32>
    %31 = vector.extract_strided_slice %0 {offsets = [4, 0], sizes = [1, 64], strides = [1, 1]} : vector<9x64xf32> to vector<1x64xf32>
    %32 = vector.shape_cast %31 : vector<1x64xf32> to vector<64xf32>
    %33 = vector.shape_cast %32 : vector<64xf32> to vector<1x1x64xf32>
    %34 = vector.broadcast %33 : vector<1x1x64xf32> to vector<2x16x64xf32>
    %35 = arith.mulf %30, %34 : vector<2x16x64xf32>
    %36 = arith.addf %29, %35 : vector<2x16x64xf32>
    %37 = vector.extract_strided_slice %22 {offsets = [0, 0, 8], sizes = [2, 16, 64], strides = [1, 1, 1]} : vector<2x16x72xf32> to vector<2x16x64xf32>
    %38 = vector.extract_strided_slice %0 {offsets = [5, 0], sizes = [1, 64], strides = [1, 1]} : vector<9x64xf32> to vector<1x64xf32>
    %39 = vector.shape_cast %38 : vector<1x64xf32> to vector<64xf32>
    %40 = vector.shape_cast %39 : vector<64xf32> to vector<1x1x64xf32>
    %41 = vector.broadcast %40 : vector<1x1x64xf32> to vector<2x16x64xf32>
    %42 = arith.mulf %37, %41 : vector<2x16x64xf32>
    %43 = arith.addf %36, %42 : vector<2x16x64xf32>
    %c0_6 = arith.constant 0 : index
    %c2 = arith.constant 2 : index
    %c0_7 = arith.constant 0 : index
    %44 = vector.load %arg0[%c0_6, %c2, %c0_7] : memref<2x18x72xf32, #tpu.memory_space<vmem>>, vector<2x16x72xf32>
    %45 = vector.extract_strided_slice %44 {offsets = [0, 0, 0], sizes = [2, 16, 64], strides = [1, 1, 1]} : vector<2x16x72xf32> to vector<2x16x64xf32>
    %46 = vector.extract_strided_slice %0 {offsets = [6, 0], sizes = [1, 64], strides = [1, 1]} : vector<9x64xf32> to vector<1x64xf32>
    %47 = vector.shape_cast %46 : vector<1x64xf32> to vector<64xf32>
    %48 = vector.shape_cast %47 : vector<64xf32> to vector<1x1x64xf32>
    %49 = vector.broadcast %48 : vector<1x1x64xf32> to vector<2x16x64xf32>
    %50 = arith.mulf %45, %49 : vector<2x16x64xf32>
    %51 = arith.addf %43, %50 : vector<2x16x64xf32>
    %52 = vector.extract_strided_slice %44 {offsets = [0, 0, 4], sizes = [2, 16, 64], strides = [1, 1, 1]} : vector<2x16x72xf32> to vector<2x16x64xf32>
    %53 = vector.extract_strided_slice %0 {offsets = [7, 0], sizes = [1, 64], strides = [1, 1]} : vector<9x64xf32> to vector<1x64xf32>
    %54 = vector.shape_cast %53 : vector<1x64xf32> to vector<64xf32>
    %55 = vector.shape_cast %54 : vector<64xf32> to vector<1x1x64xf32>
    %56 = vector.broadcast %55 : vector<1x1x64xf32> to vector<2x16x64xf32>
    %57 = arith.mulf %52, %56 : vector<2x16x64xf32>
    %58 = arith.addf %51, %57 : vector<2x16x64xf32>
    %59 = vector.extract_strided_slice %44 {offsets = [0, 0, 8], sizes = [2, 16, 64], strides = [1, 1, 1]} : vector<2x16x72xf32> to vector<2x16x64xf32>
    %60 = vector.extract_strided_slice %0 {offsets = [8, 0], sizes = [1, 64], strides = [1, 1]} : vector<9x64xf32> to vector<1x64xf32>
    %61 = vector.shape_cast %60 : vector<1x64xf32> to vector<64xf32>
    %62 = vector.shape_cast %61 : vector<64xf32> to vector<1x1x64xf32>
    %63 = vector.broadcast %62 : vector<1x1x64xf32> to vector<2x16x64xf32>
    %64 = arith.mulf %59, %63 : vector<2x16x64xf32>
    %65 = arith.addf %58, %64 : vector<2x16x64xf32>
    %cst = arith.constant dense<0.000000e+00> : vector<64xf32>
    %66 = vector.multi_reduction <add>, %65, %cst [0, 1] : vector<2x16x64xf32> to vector<64xf32>
    %67 = vector.shape_cast %66 : vector<64xf32> to vector<1x64xf32>
    %68 = arith.mulf %65, %65 : vector<2x16x64xf32>
    %cst_8 = arith.constant dense<0.000000e+00> : vector<64xf32>
    %69 = vector.multi_reduction <add>, %68, %cst_8 [0, 1] : vector<2x16x64xf32> to vector<64xf32>
    %70 = vector.shape_cast %69 : vector<64xf32> to vector<1x64xf32>
    %71 = tpu.concatenate %67, %70 in 0 : vector<1x64xf32>, vector<1x64xf32> -> vector<2x64xf32>
    %c0_9 = arith.constant 0 : index
    %c0_10 = arith.constant 0 : index
    %72 = vector.load %arg4[%c0_9, %c0_10] : memref<64x4xf32, #tpu.memory_space<vmem>>, vector<64x4xf32>
    %cst_11 = arith.constant dense<0.000000e+00> : vector<2x4xf32>
    %73 = tpu.matmul %71, %72, %cst_11 {dimension_numbers = #tpu.dot_dimension_numbers<[1], [0], [0], [1], [0, 0, 1, 1], [], []>} : vector<2x64xf32>, vector<64x4xf32>, vector<2x4xf32> -> vector<2x4xf32>
    %c0_12 = arith.constant 0 : index
    %c0_13 = arith.constant 0 : index
    %74 = vector.load %arg5[%c0_12, %c0_13] : memref<4x64xf32, #tpu.memory_space<vmem>>, vector<4x64xf32>
    %cst_14 = arith.constant dense<0.000000e+00> : vector<2x64xf32>
    %75 = tpu.matmul %73, %74, %cst_14 {dimension_numbers = #tpu.dot_dimension_numbers<[1], [0], [0], [1], [0, 0, 1, 1], [], []>} : vector<2x4xf32>, vector<4x64xf32>, vector<2x64xf32> -> vector<2x64xf32>
    %cst_15 = arith.constant 0.001953125 : f32
    %76 = vector.broadcast %cst_15 : f32 to vector<2x64xf32>
    %77 = arith.mulf %75, %76 : vector<2x64xf32>
    %78 = vector.extract_strided_slice %77 {offsets = [0, 0], sizes = [1, 64], strides = [1, 1]} : vector<2x64xf32> to vector<1x64xf32>
    %79 = vector.extract_strided_slice %77 {offsets = [1, 0], sizes = [1, 64], strides = [1, 1]} : vector<2x64xf32> to vector<1x64xf32>
    %80 = arith.mulf %78, %78 : vector<1x64xf32>
    %81 = arith.subf %79, %80 : vector<1x64xf32>
    %c0_16 = arith.constant 0 : index
    %c0_17 = arith.constant 0 : index
    %82 = vector.load %arg2[%c0_16, %c0_17] : memref<1x64xf32, #tpu.memory_space<vmem>>, vector<1x64xf32>
    %cst_18 = arith.constant 9.99999974E-6 : f32
    %83 = vector.broadcast %cst_18 : f32 to vector<1x64xf32>
    %84 = arith.addf %81, %83 : vector<1x64xf32>
    %85 = math.rsqrt %84 : vector<1x64xf32>
    %86 = arith.mulf %82, %85 : vector<1x64xf32>
    %c0_19 = arith.constant 0 : index
    %c0_20 = arith.constant 0 : index
    %87 = vector.load %arg3[%c0_19, %c0_20] : memref<1x64xf32, #tpu.memory_space<vmem>>, vector<1x64xf32>
    %88 = arith.mulf %78, %86 : vector<1x64xf32>
    %89 = arith.subf %87, %88 : vector<1x64xf32>
    %90 = vector.shape_cast %86 : vector<1x64xf32> to vector<1x1x64xf32>
    %91 = vector.broadcast %90 : vector<1x1x64xf32> to vector<2x16x64xf32>
    %92 = arith.mulf %65, %91 : vector<2x16x64xf32>
    %93 = vector.shape_cast %89 : vector<1x64xf32> to vector<1x1x64xf32>
    %94 = vector.broadcast %93 : vector<1x1x64xf32> to vector<2x16x64xf32>
    %95 = arith.addf %92, %94 : vector<2x16x64xf32>
    %96 = vector.shape_cast %95 : vector<2x16x64xf32> to vector<32x64xf32>
    %97 = arith.truncf %96 : vector<32x64xf32> to vector<32x64xbf16>
    %c0_21 = arith.constant 0 : index
    %c0_22 = arith.constant 0 : index
    %98 = vector.load %arg6[%c0_21, %c0_22] : memref<64x128xbf16, #tpu.memory_space<vmem>>, vector<64x128xbf16>
    %cst_23 = arith.constant dense<0.000000e+00> : vector<32x128xf32>
    %99 = tpu.matmul %97, %98, %cst_23 {dimension_numbers = #tpu.dot_dimension_numbers<[1], [0], [0], [1], [0, 0, 1, 1], [], []>} : vector<32x64xbf16>, vector<64x128xbf16>, vector<32x128xf32> -> vector<32x128xf32>
    %c0_24 = arith.constant 0 : index
    %c0_25 = arith.constant 0 : index
    %100 = vector.load %arg7[%c0_24, %c0_25] : memref<1x128xf32, #tpu.memory_space<vmem>>, vector<1x128xf32>
    %101 = vector.broadcast %100 : vector<1x128xf32> to vector<32x128xf32>
    %102 = arith.addf %99, %101 : vector<32x128xf32>
    %c0_26 = arith.constant 0 : index
    %c0_27 = arith.constant 0 : index
    %103 = vector.load %arg8[%c0_26, %c0_27] : memref<32x128xf32, #tpu.memory_space<vmem>>, vector<32x128xf32>
    tpu.vector_store %arg8[%c0_26, %c0_27], %102 {strides = array<i32>} : memref<32x128xf32, #tpu.memory_space<vmem>>, vector<32x128xf32>,
    return
  }
}

</mosaic_0001>

<bundles_post_ra>
// kernel: apply.1
= control target key start
LH: loop header
LB: loop body
LE: loop exit
PB: predicated region body
PF: predicated region fallthrough
CT: control target
= control target key end

     0   :  { %s483_s29 = smov 4   ;;  %s484_s10 = smov 8   ;;  %vm241_vm0 = vcmask 523264   ;;  %vm272_vm1 = vcmask 1040384   ;;  %vm310_vm2 = vcmask 1043456   ;;  %vm306_vm3 = vcmask 31744   ;;  %s758_s1 = inlined_call_operand.vmem [shape: f32[9,64], index: 1, kind: input, shape index: {}]   ;;  %s759_s0 = inlined_call_operand.vmem [shape: f32[2,18,72], index: 0, kind: input, shape index: {}]   ;;  %s760_s4 = inlined_call_operand.vmem [shape: f32[64,4], index: 4, kind: input, shape index: {}]   ;;  %s761_s5 = inlined_call_operand.vmem [shape: f32[4,64], index: 5, kind: input, shape index: {}]   ;;  %s762_s7 = inlined_call_operand.vmem [shape: f32[1,128], index: 7, kind: input, shape index: {}]   ;;  %s763_s6 = inlined_call_operand.vmem [shape: bf16[64,128], index: 6, kind: input, shape index: {}]   ;;  %s764_s2 = inlined_call_operand.vmem [shape: f32[1,64], index: 2, kind: input, shape index: {}]   ;;  %s765_s3 = inlined_call_operand.vmem [shape: f32[1,64], index: 3, kind: input, shape index: {}]   ;;  %s766_s8 = inlined_call_operand.vmem [shape: f32[32,128], index: 8, kind: output, shape index: {}]  }
   0x1   :  { %v535_v0 = vld [vmem:[%s758_s1] sm:$0xff]  ;;  %v479_v6 = vld [vmem:[%s758_s1 + $0x8] ss:$0 sm:$0xff]  ;;  %v548_v7 = vld [vmem:[%s759_s0 + $0x18] sm:$0xff]  ;;  %s485_s1 = smov 124   ;;  %s486_s19 = smov 120  }
   0x2   :  { %v41_v1 = vperm.slane %v535_v0, 1  ;;  %v112_v2 = vperm.slane %v535_v0, 4  ;;  %v183_v3 = vperm.slane %v535_v0, 7  ;;  %v70_v4 = vperm.slane %v535_v0, 2  ;;  %v553_v8 = vld [vmem:[%s759_s0 + $0x8] sm:$0xff]  ;;  %v558_v9 = vld [vmem:[%s759_s0] sm:$0xff] }
   0x3   :  { %v141_v5 = vperm.slane %v535_v0, 5  ;;  %v569_v14 = vld [vmem:[%s759_s0 + $0x20] sm:$0xff]  ;;  %v100_v26 = vld [vmem:[%s759_s0 + $0x9] sm:$0xff]  ;;  %v36_v59 = vperm.slane %v535_v0, 0  ;;  %v103_v63 = vperm.slane %v535_v0, 3 }
   0x4   :  { %43 = vrot.lane.b32.xlu0 %v41_v1, %s483_s29  ;;  %114 = vrot.lane.b32.xlu1 %v112_v2, %s483_s29  ;;  %v580_v20 = vld [vmem:[%s759_s0 + $0x1] sm:$0xff]  ;;  %v591_v25 = vld [vmem:[%s759_s0 + $0x19] sm:$0xff] }
   0x5   :  { %185 = vrot.lane.b32.xlu2 %v183_v3, %s483_s29  ;;  %v604_v30 = vld [vmem:[%s759_s0 + $0x21] sm:$0xff]  ;;  %v614_v35 = vld [vmem:[%s759_s0 + $0xa] sm:$0xff]  ;;  %v37_v60 = vmul.f32 %v36_v59, %v558_v9  ;;  %v38_v62 = vmul.f32 %v36_v59, %v553_v8 }
   0x6   :  { %v619_v36 = vld [vmem:[%s759_s0 + $0x2] sm:$0xff]  ;;  %v632_v43 = vld [vmem:[%s759_s0 + $0x1a] sm:$0xff] }
   0x7   :  { %v641_v45 = vld [vmem:[%s759_s0 + $0x22] sm:$0xff] }
   0xc   :  { %72 = vrot.lane.b32.xlu0 %v70_v4, %s484_s10  ;;  %143 = vrot.lane.b32.xlu1 %v141_v5, %s484_s10  ;;  %v104_v5 = vmul.f32 %v103_v63, %v580_v20 }
   0xd   :  { %214 = vrot.lane.b32.xlu2 %v479_v6, %s484_s10 }
  0x5f   :  { %v186_v34 = vpop.permute.xlu2 %185 }
  0x60   :  { %v189_v37 = vmul.f32 %v186_v34, %v614_v35  ;;  %v188_v38 = vmul.f32 %v186_v34, %v619_v36  ;;  %v190_v44 = vmul.f32 %v186_v34, %v632_v43  ;;  %v191_v48 = vmul.f32 %v186_v34, %v641_v45 }
  0x67   :  { %v215_v40 = vpop.permute.xlu2 %214 }
  0x68   :  { %v218_v41 = vmul.f32 %v215_v40, %v614_v35  ;;  %v217_v42 = vmul.f32 %v215_v40, %v619_v36  ;;  %v220_v46 = vmul.f32 %v215_v40, %v641_v45  ;;  %v219_v47 = vmul.f32 %v215_v40, %v632_v43 }
  0x69   :  { %v107_v40 = vmul.f32 %v103_v63, %v604_v30 }
  0x76   :  { %v44_v10 = vpop.permute.xlu0 %43  ;;  %v115_v19 = vpop.permute.xlu1 %114 }
  0x77   :  { %v48_v11 = vmul.f32 %v44_v10, %v548_v7  ;;  %v47_v12 = vmul.f32 %v44_v10, %v553_v8  ;;  %v46_v13 = vmul.f32 %v44_v10, %v558_v9  ;;  %v49_v16 = vmul.f32 %v44_v10, %v569_v14 }
  0x78   :  { %v117_v21 = vmul.f32 %v115_v19, %v580_v20  ;;  %v119_v28 = vmul.f32 %v115_v19, %v591_v25  ;;  %v118_v29 = vmul.f32 %v115_v19, %v100_v26  ;;  %v120_v33 = vmul.f32 %v115_v19, %v604_v30  ;;  %v278_v19 = vld [vmem:[%s760_s4 + $0x20] sm:$0xff] }
  0x79   :  { %58 = vrot.lane.b32.xlu2 %v48_v11, %s485_s1  ;;  %56 = vrot.lane.b32.xlu1 %v47_v12, %s485_s1  ;;  %v105_v11 = vmul.f32 %v103_v63, %v100_v26 }
  0x7a   :  { %54 = vrot.lane.b32.xlu0 %v46_v13, %s485_s1  ;;  %v281_v13 = vld [vmem:[%s760_s4 + $0x38] sm:$0xff] }
  0x7b   :  { %293 = vmatpush.msra.mxu0 %v281_v13 }
  0x7e   :  { %v73_v15 = vpop.permute.xlu0 %72  ;;  %v144_v24 = vpop.permute.xlu1 %143 }
  0x7f   :  { %v76_v17 = vmul.f32 %v73_v15, %v553_v8  ;;  %v75_v18 = vmul.f32 %v73_v15, %v558_v9  ;;  %v78_v22 = vmul.f32 %v73_v15, %v569_v14  ;;  %v77_v23 = vmul.f32 %v73_v15, %v548_v7 }
  0x80   :  { %v146_v27 = vmul.f32 %v144_v24, %v580_v20  ;;  %v148_v31 = vmul.f32 %v144_v24, %v591_v25  ;;  %v147_v32 = vmul.f32 %v144_v24, %v100_v26  ;;  %v149_v39 = vmul.f32 %v144_v24, %v604_v30  ;;  %v277_v24 = vld [vmem:[%s760_s4 + $0x18] sm:$0xff] }
  0x81   :  { %60 = vrot.lane.b32.xlu2 %v49_v16, %s485_s1  ;;  %85 = vrot.lane.b32.xlu1 %v76_v17, %s486_s19  ;;  %v39_v9 = vmul.f32 %v36_v59, %v548_v7  ;;  %v280_v16 = vld [vmem:[%s760_s4 + $0x30] sm:$0xff] }
  0x82   :  { %83 = vrot.lane.b32.xlu0 %v75_v18, %s486_s19  ;;  %294 = vmatpush.msra.mxu0 %v280_v16  ;;  %v279_v18 = vld [vmem:[%s760_s4 + $0x28] sm:$0xff] }
  0x84   :  { %295 = vmatpush.msra.mxu0 %v279_v18 }
  0x86   :  { %296 = vmatpush.msra.mxu0 %v278_v19 }
  0x88   :  { %297 = vmatpush.msra.mxu0 %v277_v24 }
  0x89   :  { %125 = vrot.lane.b32.xlu2 %v117_v21, %s485_s1  ;;  %89 = vrot.lane.b32.xlu1 %v78_v22, %s486_s19  ;;  %v174_v22 = vperm.slane %v535_v0, 6  ;;  %v276_v0 = vld [vmem:[%s760_s4 + $0x10] sm:$0xff] }
  0x8a   :  { %87 = vrot.lane.b32.xlu0 %v77_v23, %s486_s19  ;;  %v40_v23 = vmul.f32 %v36_v59, %v569_v14  ;;  %298 = vmatpush.msra.mxu0 %v276_v0 }
  0x91   :  { %154 = vrot.lane.b32.xlu2 %v146_v27, %s486_s19  ;;  %129 = vrot.lane.b32.xlu1 %v119_v28, %s485_s1  ;;  %v106_v28 = vmul.f32 %v103_v63, %v591_v25 }
  0x92   :  { %127 = vrot.lane.b32.xlu0 %v118_v29, %s485_s1  ;;  %v176_v29 = vmul.f32 %v174_v22, %v614_v35 }
  0x99   :  { %158 = vrot.lane.b32.xlu2 %v148_v31, %s486_s19  ;;  %131 = vrot.lane.b32.xlu1 %v120_v33, %s485_s1  ;;  %v175_v33 = vmul.f32 %v174_v22, %v619_v36 }
  0x9a   :  { %156 = vrot.lane.b32.xlu0 %v147_v32, %s486_s19 }
  0xa1   :  { %198 = vrot.lane.b32.xlu2 %v189_v37, %s485_s1  ;;  %196 = vrot.lane.b32.xlu1 %v188_v38, %s485_s1  ;;  %v275_v38 = vld [vmem:[%s760_s4 + $0x8] sm:$0xff] }
  0xa2   :  { %160 = vrot.lane.b32.xlu0 %v149_v39, %s486_s19  ;;  %299 = vmatpush.msra.mxu0 %v275_v38  ;;  %v470_v38 = vld [vmem:[%s763_s6 + $0x18] sm:$0xff] }
  0xa3   :  { %423 = vmatpush.bf16.msra.mxu2 %v470_v38  ;;  %471 = vmatpush.bf16.msra.mxu3 %v470_v38 }
  0xa9   :  { %227 = vrot.lane.b32.xlu2 %v218_v41, %s486_s19  ;;  %225 = vrot.lane.b32.xlu1 %v217_v42, %s486_s19  ;;  %v274_v41 = vld [vmem:[%s760_s4] sm:$0xff] }
  0xaa   :  { %200 = vrot.lane.b32.xlu0 %v190_v44, %s485_s1  ;;  %300 = vmatpush.msra.mxu0 %v274_v41 }
  0xb1   :  { %231 = vrot.lane.b32.xlu2 %v220_v46, %s486_s19  ;;  %229 = vrot.lane.b32.xlu1 %v219_v47, %s486_s19 }
  0xb2   :  { %202 = vrot.lane.b32.xlu0 %v191_v48, %s485_s1 }
  0xd3   :  { %v59_v49 = vpop.permute.xlu2 %58 }
  0xd4   :  { %v68_v20 = vadd.f32 %v59_v49, %v39_v9 }
  0xdb   :  { %v61_v50 = vpop.permute.xlu2 %60 }
  0xdc   :  { %v69_v37 = vadd.f32 %v61_v50, %v40_v23 }
  0xe3   :  { %v126_v54 = vpop.permute.xlu2 %125 }
  0xeb   :  { %v57_v51 = vpop.permute.xlu1 %56  ;;  %v155_v58 = vpop.permute.xlu2 %154 }
  0xec   :  { %v55_v52 = vpop.permute.xlu0 %54  ;;  %v67_v3 = vadd.f32 %v57_v51, %v38_v62 }
  0xed   :  { %v66_v2 = vadd.f32 %v55_v52, %v37_v60  ;;  %v177_v52 = vmul.f32 %v174_v22, %v632_v43 }
  0xf3   :  { %v86_v53 = vpop.permute.xlu1 %85  ;;  %v159_v4 = vpop.permute.xlu2 %158 }
  0xf4   :  { %v84_v55 = vpop.permute.xlu0 %83  ;;  %v96_v10 = vadd.f32 %v86_v53, %v67_v3 }
  0xf5   :  { %v95_v6 = vadd.f32 %v84_v55, %v66_v2 }
  0xf6   :  { %v109_v17 = vadd.f32 %v105_v11, %v96_v10 }
  0xf7   :  { %v108_v15 = vadd.f32 %v104_v5, %v95_v6 }
  0xf9   :  { %v137_v21 = vadd.f32 %v126_v54, %v108_v15 }
  0xfb   :  { %v90_v56 = vpop.permute.xlu1 %89  ;;  %v199_v26 = vpop.permute.xlu2 %198  ;;  %v166_v14 = vadd.f32 %v155_v58, %v137_v21 }
  0xfc   :  { %v88_v57 = vpop.permute.xlu0 %87  ;;  %v98_v35 = vadd.f32 %v90_v56, %v69_v37  ;;  %v178_v56 = vmul.f32 %v174_v22, %v641_v45 }
  0xfd   :  { %v97_v27 = vadd.f32 %v88_v57, %v68_v20  ;;  %v179_v36 = vadd.f32 %v175_v33, %v166_v14  ;;  %v305_v14 = vld [vmem:[%s761_s5] sm:$0xf] }
  0xfe   :  { %v111_v47 = vadd.f32 %v107_v40, %v98_v35  ;;  %447 = vmatpush.msk.msra.mxu1 %vm310_vm2, %v305_v14  ;;  %v469_v35 = vld [vmem:[%s763_s6 + $0x10] sm:$0xff] }
  0xff   :  { %v110_v25 = vadd.f32 %v106_v28, %v97_v27  ;;  %424 = vmatpush.bf16.msra.mxu2 %v469_v35  ;;  %472 = vmatpush.bf16.msra.mxu3 %v469_v35 }
 0x103   :  { %v130_v61 = vpop.permute.xlu1 %129  ;;  %v228_v49 = vpop.permute.xlu2 %227 }
 0x104   :  { %v128_v1 = vpop.permute.xlu0 %127  ;;  %v139_v42 = vadd.f32 %v130_v61, %v110_v25 }
 0x105   :  { %v138_v7 = vadd.f32 %v128_v1, %v109_v17 }
 0x106   :  { %v168_v50 = vadd.f32 %v159_v4, %v139_v42  ;;  %v468_v42 = vld [vmem:[%s763_s6 + $0x8] sm:$0xff] }
 0x107   :  { %425 = vmatpush.bf16.msra.mxu2 %v468_v42  ;;  %473 = vmatpush.bf16.msra.mxu3 %v468_v42 }
 0x108   :  { %v181_v58 = vadd.f32 %v177_v52, %v168_v50 }
 0x10b   :  { %v132_v12 = vpop.permute.xlu1 %131  ;;  %v232_v5 = vpop.permute.xlu2 %231 }
 0x10c   :  { %v157_v8 = vpop.permute.xlu0 %156  ;;  %v140_v30 = vadd.f32 %v132_v12, %v111_v47 }
 0x10d   :  { %v167_v31 = vadd.f32 %v157_v8, %v138_v7 }
 0x10f   :  { %v180_v39 = vadd.f32 %v176_v29, %v167_v31 }
 0x111   :  { %v209_v44 = vadd.f32 %v199_v26, %v180_v39 }
 0x113   :  { %v197_v32 = vpop.permute.xlu1 %196  ;;  %v688_v54 = vadd.f32 %v228_v49, %v209_v44  ;;  %v467_v44 = vld [vmem:[%s763_s6] sm:$0xff] }
 0x114   :  { %v161_v34 = vpop.permute.xlu0 %160  ;;  %v208_v46 = vadd.f32 %v197_v32, %v179_v36  ;;  %426 = vmatpush.bf16.msra.mxu2 %v467_v44  ;;  %474 = vmatpush.bf16.msra.mxu3 %v467_v44 }
 0x115   :  { %v169_v55 = vadd.f32 %v161_v34, %v140_v30  ;;  %v256_v60 = vmul.f32 %v688_v54, %v688_v54  ;;  %v243_v63 = vsel %vm241_vm0, %v688_v54, 0.0  ;;  %v340_v30 = vld [vmem:[%s764_s2] sm:$0x1] }
 0x117   :  { %v182_v62 = vadd.f32 %v178_v56, %v169_v55  ;;  %v260_v6 = vsel %vm241_vm0, %v256_v60, 0.0 }
 0x11b   :  { %v226_v48 = vpop.permute.xlu1 %225 }
 0x11c   :  { %v685_v51 = vadd.f32 %v226_v48, %v208_v46  ;;  %v201_v53 = vpop.permute.xlu0 %200 }
 0x11d   :  { %v210_v61 = vadd.f32 %v201_v53, %v181_v58 }
 0x11e   :  { %v255_v57 = vmul.f32 %v685_v51, %v685_v51  ;;  %v242_v59 = vsel %vm241_vm0, %v685_v51, 0.0 }
 0x11f   :  { %v244_v3 = vadd.f32 %v243_v63, %v242_v59 }
 0x120   :  { %v259_v1 = vsel %vm241_vm0, %v255_v57, 0.0  ;;  %v358_v57 = vld [vmem:[%s765_s3] sm:$0x1] }
 0x121   :  { %v261_v12 = vadd.f32 %v260_v6, %v259_v1 }
 0x123   :  { %v230_v43 = vpop.permute.xlu1 %229 }
 0x124   :  { %v700_v45 = vadd.f32 %v230_v43, %v210_v61  ;;  %v203_v2 = vpop.permute.xlu0 %202 }
 0x125   :  { %v211_v4 = vadd.f32 %v203_v2, %v182_v62 }
 0x126   :  { %v245_v10 = vsel %vm241_vm0, %v700_v45, 0.0  ;;  %v257_v11 = vmul.f32 %v700_v45, %v700_v45 }
 0x127   :  { %v246_v13 = vadd.f32 %v245_v10, %v244_v3  ;;  %v707_v9 = vadd.f32 %v232_v5, %v211_v4 }
 0x128   :  { %v262_v15 = vsel %vm241_vm0, %v257_v11, 0.0 }
 0x129   :  { %v263_v8 = vadd.f32 %v262_v15, %v261_v12  ;;  %v247_v16 = vsel %vm241_vm0, %v707_v9, 0.0  ;;  %v258_v17 = vmul.f32 %v707_v9, %v707_v9 }
 0x12a   :  { %v248_v18 = vadd.f32 %v247_v16, %v246_v13 }
 0x12b   :  { %v264_v19 = vsel %vm241_vm0, %v258_v17, 0.0 }
 0x12c   :  { %v249_v20 = vrot.slane %v248_v18, 4  ;;  %v265_v21 = vadd.f32 %v264_v19, %v263_v8 }
 0x12e   :  { %v250_v7 = vadd.f32 %v249_v20, %v248_v18  ;;  %v266_v22 = vrot.slane %v265_v21, 4 }
 0x130   :  { %v251_v23 = vrot.slane %v250_v7, 2  ;;  %v267_v24 = vadd.f32 %v266_v22, %v265_v21 }
 0x132   :  { %v252_v26 = vadd.f32 %v251_v23, %v250_v7  ;;  %v268_v27 = vrot.slane %v267_v24, 2 }
 0x134   :  { %v253_v28 = vrot.slane %v252_v26, 1  ;;  %v269_v29 = vadd.f32 %v268_v27, %v267_v24 }
 0x136   :  { %v270_v31 = vrot.slane %v269_v29, 1  ;;  %v254_v32 = vadd.f32 %v253_v28, %v252_v26 }
 0x138   :  { %v271_v0 = vadd.f32 %v270_v31, %v269_v29 }
 0x13a   :  { %v273_v33 = vsel %vm272_vm1, %v254_v32, %v271_v0 }
 0x13b   :  { %446 = vmatmul.msk.f32.vlgmr.msra.gmra.mxu0 %vm241_vm0, %v273_v33 }
 0x1b8   :  { %v302_v34 = vpop.f32.mrf.mxu0 }
 0x1b9   :  { %448 = vmatmul.msk.f32.vlgmr.msra.gmra.mxu1 %vm306_vm3, %v302_v34 }
 0x236   :  { %v331_v37 = vpop.f32.mrf.mxu1 }
 0x237   :  { %v334_v25 = vmul.f32 0.001953125, %v331_v37 }
 0x239   :  { %v335_v39 = vmul.f32 %v334_v25, %v334_v25 }
 0x23b   :  { %v337_v40 = vrot.slane %v335_v39, 7 }
 0x23d   :  { %v339_v41 = vsub.f32 %v334_v25, %v337_v40 }
 0x23f   :  { %v341_v36 = vadd.f32 1e-05, %v339_v41 }
 0x241   :  { %481 = vrsqrt.f32 %v341_v36  ;;  %vm348_vm5 = vweird.f32 %v341_v36 }
 0x247   :  { %v482_v46 = vpop.eup %481 }
 0x248   :  { %v343_v47 = vmul.f32 %v482_v46, %v341_v36  ;;  %vm349_vm4 = vweird.f32 %v482_v46 }
 0x249   :  { %vm350_vm6 = vmor %vm348_vm5, %vm349_vm4 }
 0x24a   :  { %v344_v48 = vmul.f32 %v482_v46, %v343_v47 }
 0x24c   :  { %v345_v49 = vmul.f32 0.5, %v344_v48 }
 0x24e   :  { %v346_v50 = vsub.f32 1.5, %v345_v49 }
 0x250   :  { %v347_v52 = vmul.f32 %v482_v46, %v346_v50 }
 0x252   :  { %v351_v53 = vsel %vm350_vm6, %v482_v46, %v347_v52 }
 0x253   :  { %353 = vst [vmem:[#allocation1] sm:$0xff] %v351_v53 }
 0x25a   :  { %v355_v55 = vld [vmem:[#allocation1 + $0x1] ss:$9 sm:$0xff] }
 0x25b   :  { %v357_v56 = vmul.f32 %v355_v55, %v340_v30 }
 0x25d   :  { %v359_v58 = vmul.f32 %v357_v56, %v334_v25  ;;  %v362_v59 = vperm.slane %v357_v56, 0 }
 0x25f   :  { %v360_v60 = vsub.f32 %v358_v57, %v359_v58  ;;  %v364_v61 = vmul.f32 %v362_v59, %v685_v51  ;;  %v365_v62 = vmul.f32 %v362_v59, %v688_v54  ;;  %v366_v63 = vmul.f32 %v362_v59, %v700_v45  ;;  %v480_v51 = vld [vmem:[%s762_s7] ss:$0 sm:$0xff] }
 0x260   :  { %v367_v1 = vmul.f32 %v362_v59, %v707_v9 }
 0x261   :  { %v369_v43 = vperm.slane %v360_v60, 0 }
 0x263   :  { %v371_v2 = vadd.f32 %v369_v43, %v364_v61  ;;  %v372_v3 = vadd.f32 %v369_v43, %v365_v62  ;;  %v373_v4 = vadd.f32 %v369_v43, %v366_v63  ;;  %v374_v5 = vadd.f32 %v369_v43, %v367_v1 }
 0x265   :  { %v375_v6 = vpack.c.bf16 %v372_v3, %v371_v2  ;;  %v376_v10 = vpack.c.bf16 %v374_v5, %v373_v4 }
 0x267   :  { %465 = vmatmul.msk.bf16.vlgmr.msra.gmra.mxu2 %vm241_vm0, %v375_v6  ;;  %466 = vmatmul.msk.bf16.vlgmr.msra.gmra.mxu3 %vm241_vm0, %v376_v10 }
 0x2ea   :  { %v428_v11 = vpop.f32.mrf.mxu2  ;;  %v433_v54 = vpop.f32.mrf.mxu3 }
 0x2eb   :  { %v429_v12 = vadd.f32 %v480_v51, %v428_v11  ;;  %v434_v45 = vadd.f32 %v480_v51, %v433_v54 }
 0x2ed   :  { %438 = vst [vmem:[%s766_s8] sm:$0xff] %v429_v12 }
 0x2ee   :  { %440 = vst [vmem:[%s766_s8 + $0x10] sm:$0xff] %v434_v45 }
 0x2f2   :  { %v430_v13 = vpop.f32.mrf.mxu2  ;;  %v435_v9 = vpop.f32.mrf.mxu3 }
 0x2f3   :  { %v431_v15 = vadd.f32 %v480_v51, %v430_v13  ;;  %v436_v8 = vadd.f32 %v480_v51, %v435_v9 }
 0x2f5   :  { %439 = vst [vmem:[%s766_s8 + $0x8] sm:$0xff] %v431_v15 }
 0x2f6   :  { %441 = vst [vmem:[%s766_s8 + $0x18] sm:$0xff] %v436_v8 }

</bundles_post_ra>
